<compile_context>
chip_gen: v7x
topology: tpu7x:2x2x1
jax: 0.10.0
libtpu: 0.0.40
codegen_flags: <defaults>
</compile_context>

<pallas_src>
import math

import jax
import jax.numpy as jnp
from jax.experimental import pallas as pl
from jax.experimental.pallas import tpu as pltpu


def _round_up(x, m):
    return ((x + m - 1) // m) * m


def _choose_tile(dim_p, target):
    """Largest multiple of 128 that divides dim_p (itself a multiple of 128) and is <= target."""
    t = min(target, dim_p)
    t -= t % 128
    t = max(t, 128)
    while dim_p % t != 0:
        t -= 128
    return t


def _tile_targets():
    """Generation-aware tile targets (multiples of 128)."""
    # Safe defaults for v7x (64 MiB physical / ~32 MiB default scoped VMEM).
    tm_t, tn_t, tk_t = 256, 256, 512
    try:
        vmem = pltpu.get_tpu_info().vmem_capacity_bytes
        if vmem >= 96 * 1024 * 1024:
            # v5e / v6e (128 MiB VMEM): larger k-tiles amortize per-step DMA
            # overhead and keep the single MXU fed.
            tm_t, tn_t, tk_t = 512, 256, 1024
    except Exception:
        pass
    return tm_t, tn_t, tk_t


# ---------------------------------------------------------------------------
# Kernels
# ---------------------------------------------------------------------------

def _fused_gcn_kernel(adj_ref, x_ref, w_ref, b_ref, o_ref, acc_ref):
    """out[i,j] = sum_k adj[i,k] @ (x[k,:] @ w[:,j]) + bias[j]."""
    k = pl.program_id(2)

    @pl.when(k == 0)
    def _init():
        acc_ref[...] = jnp.zeros_like(acc_ref)

    # support_block = x[k_tile, :] @ w[:, j_tile]   (tk, in_f) @ (in_f, tn)
    support = jnp.dot(x_ref[...], w_ref[...], preferred_element_type=jnp.float32)
    # acc += adj[i_tile, k_tile] @ support_block    (tm, tk) @ (tk, tn)
    acc_ref[...] += jnp.dot(adj_ref[...], support, preferred_element_type=jnp.float32)

    @pl.when(k == pl.num_programs(2) - 1)
    def _finalize():
        o_ref[...] = (acc_ref[...] + b_ref[...]).astype(o_ref.dtype)


def _mm_bias_kernel(a_ref, b_ref, bias_ref, o_ref, acc_ref):
    """Generic tiled  out = a @ b + bias  with k-reduction innermost."""
    k = pl.program_id(2)

    @pl.when(k == 0)
    def _init():
        acc_ref[...] = jnp.zeros_like(acc_ref)

    acc_ref[...] += jnp.dot(a_ref[...], b_ref[...], preferred_element_type=jnp.float32)

    @pl.when(k == pl.num_programs(2) - 1)
    def _finalize():
        o_ref[...] = (acc_ref[...] + bias_ref[...]).astype(o_ref.dtype)


# ---------------------------------------------------------------------------
# pallas_call wrappers (already-padded, tile-divisible shapes)
# ---------------------------------------------------------------------------

def _fused_gcn(adj_p, x_p, w_p, b_p, tm, tn, tk):
    n_p, in_f_p = x_p.shape
    out_f_p = w_p.shape[1]
    grid = (n_p // tm, out_f_p // tn, n_p // tk)
    flops = 2 * n_p * n_p * out_f_p + 2 * n_p * in_f_p * out_f_p * (n_p // tm)
    bytes_accessed = 4 * (n_p * n_p + n_p * in_f_p + in_f_p * out_f_p
                          + n_p * out_f_p + out_f_p)
    return pl.pallas_call(
        _fused_gcn_kernel,
        out_shape=jax.ShapeDtypeStruct((n_p, out_f_p), jnp.float32),
        grid=grid,
        in_specs=[
            pl.BlockSpec((tm, tk), lambda i, j, k: (i, k)),       # adj tile
            pl.BlockSpec((tk, in_f_p), lambda i, j, k: (k, 0)),   # x rows of k-tile
            pl.BlockSpec((in_f_p, tn), lambda i, j, k: (0, j)),   # weight cols of j-tile
            pl.BlockSpec((1, tn), lambda i, j, k: (0, j)),        # bias, pinned across i & k
        ],
        out_specs=pl.BlockSpec((tm, tn), lambda i, j, k: (i, j)),
        scratch_shapes=[pltpu.VMEM((tm, tn), jnp.float32)],
        compiler_params=pltpu.CompilerParams(
            dimension_semantics=("parallel", "parallel", "arbitrary"),
        ),
        cost_estimate=pl.CostEstimate(
            flops=flops, transcendentals=0, bytes_accessed=bytes_accessed
        ),
    )(adj_p, x_p, w_p, b_p)


def _tiled_matmul_bias(a, b, bias2d, tm, tn, tk):
    m, kdim = a.shape
    n = b.shape[1]
    grid = (m // tm, n // tn, kdim // tk)
    flops = 2 * m * n * kdim
    bytes_accessed = 4 * (m * kdim + kdim * n + m * n + n)
    return pl.pallas_call(
        _mm_bias_kernel,
        out_shape=jax.ShapeDtypeStruct((m, n), jnp.float32),
        grid=grid,
        in_specs=[
            pl.BlockSpec((tm, tk), lambda i, j, k: (i, k)),
            pl.BlockSpec((tk, tn), lambda i, j, k: (k, j)),
            pl.BlockSpec((1, tn), lambda i, j, k: (0, j)),
        ],
        out_specs=pl.BlockSpec((tm, tn), lambda i, j, k: (i, j)),
        scratch_shapes=[pltpu.VMEM((tm, tn), jnp.float32)],
        compiler_params=pltpu.CompilerParams(
            dimension_semantics=("parallel", "parallel", "arbitrary"),
        ),
        cost_estimate=pl.CostEstimate(
            flops=flops, transcendentals=0, bytes_accessed=bytes_accessed
        ),
    )(a, b, bias2d)


# ---------------------------------------------------------------------------
# Public forward
# ---------------------------------------------------------------------------

def graph_convolution(x, adj, weight, bias, *, split_support=None):
    """GCN forward: adj @ (x @ weight) + bias (float32 accumulation).

    split_support=None -> heuristic: fused recompute when in_features is narrow,
    two tiled pallas_calls (support materialized in HBM) when it is wide.
    """
    n, in_f = x.shape
    in_f_w, out_f = weight.shape
    assert in_f_w == in_f
    assert adj.shape == (n, n)

    x = x.astype(jnp.float32)
    adj = adj.astype(jnp.float32)
    weight = weight.astype(jnp.float32)
    bias2d = bias.astype(jnp.float32).reshape(1, out_f)

    # Pad every dimension to a multiple of 128 so all matmul tiles (and the
    # output store path) are lane/sublane dense; zero padding preserves the
    # math exactly and is sliced off at the end.
    n_p = _round_up(n, 128)
    in_f_p = _round_up(in_f, 128)
    out_f_p = _round_up(out_f, 128)

    x_p = jnp.pad(x, ((0, n_p - n), (0, in_f_p - in_f)))
    adj_p = jnp.pad(adj, ((0, n_p - n), (0, n_p - n)))
    w_p = jnp.pad(weight, ((0, in_f_p - in_f), (0, out_f_p - out_f)))
    b_p = jnp.pad(bias2d, ((0, 0), (0, out_f_p - out_f)))

    tm_t, tn_t, tk_t = _tile_targets()
    tm = _choose_tile(n_p, tm_t)
    tk = _choose_tile(n_p, tk_t)
    tn = _choose_tile(out_f_p, tn_t)

    if split_support is None:
        # Fused kernel recomputes x[k_tile] @ w once per row tile:
        # extra ~2*N*in_f*out_f*(N/tm) FLOPs -- negligible for narrow features,
        # wasteful for wide ones.
        split_support = in_f_p > 512

    if not split_support:
        out_p = _fused_gcn(adj_p, x_p, w_p, b_p, tm, tn, tk)
    else:
        tkf = _choose_tile(in_f_p, tk_t)
        zero_bias = jnp.zeros((1, out_f_p), jnp.float32)
        support = _tiled_matmul_bias(x_p, w_p, zero_bias, tm, tn, tkf)
        out_p = _tiled_matmul_bias(adj_p, support, b_p, tm, tn, tk)

    # TODO(synk): optional bf16 input casting (keep f32 accumulation + f32 bias)
    # for ~2x MXU/HBM on v6e/v7x when the model tolerates it.
    return out_p[:n, :out_f]


if __name__ == "__main__":
    # Small shapes consistent with the module: N nodes, in_features -> out_features.
    # Intentionally non-multiples of 128 to exercise the padding/slicing path.
    N = 200
    in_features = 48
    out_features = 96

    key = jax.random.PRNGKey(0)
    k_x, k_adj, k_w, k_b = jax.random.split(key, 4)

    # Deterministic parameter init mirroring reset_parameters():
    # uniform(-stdv, stdv) with stdv = 1/sqrt(out_features).
    stdv = 1.0 / math.sqrt(out_features)
    weight = jax.random.uniform(
        k_w, (in_features, out_features), minval=-stdv, maxval=stdv, dtype=jnp.float32
    )
    bias = jax.random.uniform(
        k_b, (out_features,), minval=-stdv, maxval=stdv, dtype=jnp.float32
    )

    x = jax.random.normal(k_x, (N, in_features), dtype=jnp.float32)
    adj_raw = jax.random.uniform(k_adj, (N, N), dtype=jnp.float32)
    adj = adj_raw / jnp.sum(adj_raw, axis=1, keepdims=True)  # row-normalize

    # Reference in plain JAX (same math as the PyTorch forward).
    ref = adj @ (x @ weight) + bias

    out_fused = jax.block_until_ready(
        graph_convolution(x, adj, weight, bias, split_support=False)
    )
    out_split = jax.block_until_ready(
        graph_convolution(x, adj, weight, bias, split_support=True)
    )

    assert out_fused.shape == (N, out_features)
    assert out_split.shape == (N, out_features)
    assert jnp.allclose(out_fused, ref, atol=1e-4, rtol=1e-4)
    assert jnp.allclose(out_split, ref, atol=1e-4, rtol=1e-4)

    print("KERNEL_OK")
</pallas_src>

<mosaic_0001>
module attributes {stable_mosaic.version = 11 : i64} {
  func.func @_fused_gcn_kernel(%arg0: i32, %arg1: i32, %arg2: i32, %arg3: memref<256x256xf32, #tpu.memory_space<vmem>>, %arg4: memref<256x128xf32, #tpu.memory_space<vmem>>, %arg5: memref<128x128xf32, #tpu.memory_space<vmem>>, %arg6: memref<1x128xf32, #tpu.memory_space<vmem>>, %arg7: memref<256x128xf32, #tpu.memory_space<vmem>>, %arg8: memref<256x128xf32, #tpu.memory_space<vmem>>) attributes {dimension_semantics = [#tpu.dimension_semantics<parallel>, #tpu.dimension_semantics<parallel>, #tpu.dimension_semantics<arbitrary>], iteration_bounds = array<i64: 1, 1, 1>, scalar_prefetch = 0 : i64, scratch_operands = 1 : i64, tpu.core_type = #tpu.core_type<tc>, window_params = [{transform_indices = @transform_0, window_bounds = array<i64: 256, 256>}, {transform_indices = @transform_1, window_bounds = array<i64: 256, 128>}, {transform_indices = @transform_2, window_bounds = array<i64: 128, 128>}, {transform_indices = @transform_3, window_bounds = array<i64: 1, 128>}, {transform_indices = @transform_4, window_bounds = array<i64: 256, 128>}]} {
    %c0_i32 = arith.constant 0 : i32
    %0 = arith.cmpi eq, %arg2, %c0_i32 : i32
    %1 = arith.extui %0 : i1 to i32
    %c0_i32_0 = arith.constant 0 : i32
    %2 = arith.cmpi ne, %1, %c0_i32_0 : i32
    scf.if %2 {
      %cst_13 = arith.constant 0.000000e+00 : f32
      %14 = vector.broadcast %cst_13 : f32 to vector<256x128xf32>
      %c0_14 = arith.constant 0 : index
      %c0_15 = arith.constant 0 : index
      %15 = vector.load %arg8[%c0_14, %c0_15] : memref<256x128xf32, #tpu.memory_space<vmem>>, vector<256x128xf32>
      tpu.vector_store %arg8[%c0_14, %c0_15], %14 {strides = array<i32>} : memref<256x128xf32, #tpu.memory_space<vmem>>, vector<256x128xf32>,
    } else {
    }
    %c0 = arith.constant 0 : index
    %c0_1 = arith.constant 0 : index
    %3 = vector.load %arg4[%c0, %c0_1] : memref<256x128xf32, #tpu.memory_space<vmem>>, vector<256x128xf32>
    %c0_2 = arith.constant 0 : index
    %c0_3 = arith.constant 0 : index
    %4 = vector.load %arg5[%c0_2, %c0_3] : memref<128x128xf32, #tpu.memory_space<vmem>>, vector<128x128xf32>
    %cst = arith.constant dense<0.000000e+00> : vector<256x128xf32>
    %5 = tpu.matmul %3, %4, %cst {dimension_numbers = #tpu.dot_dimension_numbers<[1], [0], [0], [1], [0, 0, 1, 1], [], []>} : vector<256x128xf32>, vector<128x128xf32>, vector<256x128xf32> -> vector<256x128xf32>
    %c0_4 = arith.constant 0 : index
    %c0_5 = arith.constant 0 : index
    %6 = vector.load %arg8[%c0_4, %c0_5] : memref<256x128xf32, #tpu.memory_space<vmem>>, vector<256x128xf32>
    %c0_6 = arith.constant 0 : index
    %c0_7 = arith.constant 0 : index
    %7 = vector.load %arg3[%c0_6, %c0_7] : memref<256x256xf32, #tpu.memory_space<vmem>>, vector<256x256xf32>
    %cst_8 = arith.constant dense<0.000000e+00> : vector<256x128xf32>
    %8 = tpu.matmul %7, %5, %cst_8 {dimension_numbers = #tpu.dot_dimension_numbers<[1], [0], [0], [1], [0, 0, 1, 1], [], []>} : vector<256x256xf32>, vector<256x128xf32>, vector<256x128xf32> -> vector<256x128xf32>
    %9 = arith.addf %6, %8 : vector<256x128xf32>
    %c0_9 = arith.constant 0 : index
    %c0_10 = arith.constant 0 : index
    %10 = vector.load %arg8[%c0_9, %c0_10] : memref<256x128xf32, #tpu.memory_space<vmem>>, vector<256x128xf32>
    tpu.vector_store %arg8[%c0_9, %c0_10], %9 {strides = array<i32>} : memref<256x128xf32, #tpu.memory_space<vmem>>, vector<256x128xf32>,
    %c0_i32_11 = arith.constant 0 : i32
    %11 = arith.cmpi eq, %arg2, %c0_i32_11 : i32
    %12 = arith.extui %11 : i1 to i32
    %c0_i32_12 = arith.constant 0 : i32
    %13 = arith.cmpi ne, %12, %c0_i32_12 : i32
    scf.if %13 {
      %c0_13 = arith.constant 0 : index
      %c0_14 = arith.constant 0 : index
      %14 = vector.load %arg8[%c0_13, %c0_14] : memref<256x128xf32, #tpu.memory_space<vmem>>, vector<256x128xf32>
      %c0_15 = arith.constant 0 : index
      %c0_16 = arith.constant 0 : index
      %15 = vector.load %arg6[%c0_15, %c0_16] : memref<1x128xf32, #tpu.memory_space<vmem>>, vector<1x128xf32>
      %16 = vector.broadcast %15 : vector<1x128xf32> to vector<256x128xf32>
      %17 = arith.addf %14, %16 : vector<256x128xf32>
      %c0_17 = arith.constant 0 : index
      %c0_18 = arith.constant 0 : index
      %18 = vector.load %arg7[%c0_17, %c0_18] : memref<256x128xf32, #tpu.memory_space<vmem>>, vector<256x128xf32>
      tpu.vector_store %arg7[%c0_17, %c0_18], %17 {strides = array<i32>} : memref<256x128xf32, #tpu.memory_space<vmem>>, vector<256x128xf32>,
    } else {
    }
    return
  }
  func.func @transform_0(%arg0: i32, %arg1: i32, %arg2: i32) -> (i32, i32) {
    %c0_i32 = arith.constant 0 : i32
    return %arg0, %arg2 : i32, i32
  }
  func.func @transform_1(%arg0: i32, %arg1: i32, %arg2: i32) -> (i32, i32) {
    %c0_i32 = arith.constant 0 : i32
    %c0_i32_0 = arith.constant 0 : i32
    return %arg2, %c0_i32 : i32, i32
  }
  func.func @transform_2(%arg0: i32, %arg1: i32, %arg2: i32) -> (i32, i32) {
    %c0_i32 = arith.constant 0 : i32
    %c0_i32_0 = arith.constant 0 : i32
    return %c0_i32, %arg1 : i32, i32
  }
  func.func @transform_3(%arg0: i32, %arg1: i32, %arg2: i32) -> (i32, i32) {
    %c0_i32 = arith.constant 0 : i32
    %c0_i32_0 = arith.constant 0 : i32
    return %c0_i32, %arg1 : i32, i32
  }
  func.func @transform_4(%arg0: i32, %arg1: i32, %arg2: i32) -> (i32, i32) {
    %c0_i32 = arith.constant 0 : i32
    return %arg0, %arg1 : i32, i32
  }
}

</mosaic_0001>

<bundles_post_ra>
// kernel: tpu_custom_call.1
= control target key start
LH: loop header
LB: loop body
LE: loop exit
PB: predicated region body
PF: predicated region fallthrough
CT: control target
= control target key end

     0   :  { %9 = vsyncpa [#allocation4], 0  ;;  %s1381_s0 = inlined_call_operand.hbm [shape: f32[256,256], index: 0, kind: input, shape index: {}]   ;;  %s1382_s1 = inlined_call_operand.hbm [shape: f32[256,128], index: 1, kind: input, shape index: {}]   ;;  %s1383_s2 = inlined_call_operand.hbm [shape: f32[128,128], index: 2, kind: input, shape index: {}]   ;;  %s1384_s3 = inlined_call_operand.vmem [shape: f32[1,128], index: 3, kind: input, shape index: {}]   ;;  %s1385_s4 = inlined_call_operand.hbm [shape: f32[256,128], index: 4, kind: output, shape index: {}]  }
   0x1   :  { %10 = vsyncpa [#allocation7], 0 }
   0x2   :  { %11 = vsyncpa [#allocation5], 0  ;;  %s1221_s15 = smov [#allocation6]   ;;  %s1127_s19 = scalar_lea.hbm %s1382_s1, 4096 }
   0x3   :  { %s29_s16 = sshll.u32 %s1221_s15, 4  ;;  %p1128_p0 = scmp.ne.s32.totalorder %s1382_s1, %s1127_s19  ;;  %s30_s16 = int_to_ptr.vmem [resolvable:$true] %s29_s16 }
   0x4   :  { %p1131_p1 = scmp.lt.u32.totalorder %s1127_s19, %s1382_s1 }
   0x6   :  { %p1133_p2 = pnand %p1131_p1, %p1128_p0 }
   0x8   :  { %1136 = shalt.err (!%p1133_p2)
}
   0x9   :  { %s1137_s24 = scalar_lea.vmem %s30_s16, 4096  ;;  %p1142_p4 = scmp.lt.s32.totalorder %s30_s16, %s30_s16 }
   0xa   :  { %p1138_p3 = scmp.ne.s32.totalorder %s30_s16, %s1137_s24  ;;  %p1143_p5 = scmp.lt.s32.totalorder %s1137_s24, %s1137_s24 }
   0xc   :  { %p1144_p6 = por %p1143_p5, %p1142_p4 }
   0xe   :  { %p1145_p7 = pnand %p1144_p6, %p1138_p3 }
  0x10   :  { %1148 = shalt.err (!%p1145_p7)
}
  0x11   :  { %s1222_s25 = smov 128   ;;  %s1223_s26 = smov 8  }
  0x12   :  { %35 = dma.hbm_to_vmem [thread:$0]  %s1382_s1, 4096, %s30_s16, [#allocation7], %s1222_s25, %s1222_s25, %s1223_s26  }
  0x13   :  { %s1224_s29 = smov [#allocation3]   ;;  %s1149_s7 = scalar_lea.hbm %s1381_s0, 8192 }
  0x14   :  { %s17_s30 = sshll.u32 %s1224_s29, 4  ;;  %p1150_p8 = scmp.ne.s32.totalorder %s1381_s0, %s1149_s7  ;;  %s18_s30 = int_to_ptr.vmem [resolvable:$true] %s17_s30 }
  0x15   :  { %p1153_p9 = scmp.lt.u32.totalorder %s1149_s7, %s1381_s0 }
  0x17   :  { %p1155_p10 = pnand %p1153_p9, %p1150_p8 }
  0x19   :  { %1158 = shalt.err (!%p1155_p10)
}
  0x1a   :  { %s1159_s12 = scalar_lea.vmem %s18_s30, 8192  ;;  %p1164_p12 = scmp.lt.s32.totalorder %s18_s30, %s18_s30 }
  0x1b   :  { %p1160_p11 = scmp.ne.s32.totalorder %s18_s30, %s1159_s12  ;;  %p1165_p13 = scmp.lt.s32.totalorder %s1159_s12, %s1159_s12 }
  0x1d   :  { %p1166_p0 = por %p1165_p13, %p1164_p12 }
  0x1f   :  { %p1167_p1 = pnand %p1166_p0, %p1160_p11 }
  0x21   :  { %1170 = shalt.err (!%p1167_p1)
}
  0x22   :  { %s1225_s1 = smov 256   ;;  %s1226_s13 = smov 16  }
  0x23   :  { %23 = dma.hbm_to_vmem [thread:$0]  %s1381_s0, 8192, %s18_s30, [#allocation4], %s1225_s1, %s1225_s1, %s1226_s13  }
  0x24   :  { %s1227_s16 = smov [#allocation8]   ;;  %s1171_s20 = scalar_lea.hbm %s1383_s2, 2048 }
  0x25   :  { %s41_s17 = sshll.u32 %s1227_s16, 4  ;;  %p1172_p2 = scmp.ne.s32.totalorder %s1383_s2, %s1171_s20  ;;  %s42_s17 = int_to_ptr.vmem [resolvable:$true] %s41_s17 }
  0x26   :  { %p1175_p3 = scmp.lt.u32.totalorder %s1171_s20, %s1383_s2 }
  0x28   :  { %p1177_p4 = pnand %p1175_p3, %p1172_p2 }
  0x2a   :  { %1180 = shalt.err (!%p1177_p4)
}
  0x2b   :  { %s1181_s27 = scalar_lea.vmem %s42_s17, 2048  ;;  %p1186_p6 = scmp.lt.s32.totalorder %s42_s17, %s42_s17 }
  0x2c   :  { %p1182_p5 = scmp.ne.s32.totalorder %s42_s17, %s1181_s27  ;;  %p1187_p7 = scmp.lt.s32.totalorder %s1181_s27, %s1181_s27 }
  0x2e   :  { %p1188_p8 = por %p1187_p7, %p1186_p6 }
  0x30   :  { %p1189_p9 = pnand %p1188_p8, %p1182_p5 }
  0x32   :  { %1192 = shalt.err (!%p1189_p9)
}
  0x33   :  { %47 = dma.hbm_to_vmem [thread:$0]  %s1383_s2, 2048, %s42_s17, [#allocation7], %s1222_s25, %s1222_s25, %s1223_s26  }
  0x34   :  { %1215 = dma.done.wait [#allocation4], 8192  }
  0x35   :  { %1216 = vsyncadd [#allocation4], 4294959104 }
  0x36   :  { %1217 = dma.done.wait [#allocation7], 6144  }
  0x37   :  { %1218 = vsyncadd [#allocation7], 4294961152  ;;  %v127_v0 = vld [vmem:[#allocation8] sm:$0xff]  ;;  %v128_v1 = vld [vmem:[#allocation8 + $0x8] sm:$0xff]  ;;  %v1228_v56 = vmov 0.0|0.0  }
  0x38   :  { %v129_v2 = vld [vmem:[#allocation8 + $0x10] sm:$0xff]  ;;  %v1006_v3 = vpack.c.bf16 %v128_v1, %v127_v0  ;;  %v130_v4 = vld [vmem:[#allocation8 + $0x18] sm:$0xff]  ;;  %v131_v6 = vld [vmem:[#allocation8 + $0x20] sm:$0xff]  ;;  %1086 = vmatprep.subr.bf16.mxu1 %v1228_v56 }
  0x39   :  { %v1010_v5 = vpack.c.bf16 %v130_v4, %v129_v2  ;;  %v132_v7 = vld [vmem:[#allocation8 + $0x28] sm:$0xff]  ;;  %v95_v9 = vld [vmem:[#allocation6] sm:$0xff]  ;;  %v133_v10 = vld [vmem:[#allocation8 + $0x30] sm:$0xff] }
  0x3a   :  { %1007 = vmatprep.subr.bf16.mxu0 %v1006_v3  ;;  %v1014_v8 = vpack.c.bf16 %v132_v7, %v131_v6  ;;  %v134_v11 = vld [vmem:[#allocation8 + $0x38] sm:$0xff]  ;;  %958 = vmatprep.mubr.f32.mxu0 %v95_v9  ;;  %v135_v13 = vld [vmem:[#allocation8 + $0x40] sm:$0xff]  ;;  %v136_v14 = vld [vmem:[#allocation8 + $0x48] sm:$0xff] }
  0x3b   :  { %1009 = vmatpush3.bf16.msra.mxu0 %v1006_v3  ;;  %v1018_v12 = vpack.c.bf16 %v134_v11, %v133_v10  ;;  %v1022_v15 = vpack.c.bf16 %v136_v14, %v135_v13  ;;  %v137_v16 = vld [vmem:[#allocation8 + $0x50] sm:$0xff]  ;;  %v138_v17 = vld [vmem:[#allocation8 + $0x58] sm:$0xff]  ;;  %v139_v19 = vld [vmem:[#allocation8 + $0x60] sm:$0xff] }
  0x3c   :  { %1011 = vmatprep.subr.bf16.mxu0 %v1010_v5  ;;  %v1026_v18 = vpack.c.bf16 %v138_v17, %v137_v16  ;;  %v140_v20 = vld [vmem:[#allocation8 + $0x68] sm:$0xff]  ;;  %v141_v22 = vld [vmem:[#allocation8 + $0x70] sm:$0xff]  ;;  %v142_v23 = vld [vmem:[#allocation8 + $0x78] sm:$0xff] }
  0x3d   :  { %v1030_v21 = vpack.c.bf16 %v140_v20, %v139_v19  ;;  %v1034_v24 = vpack.c.bf16 %v142_v23, %v141_v22  ;;  %v96_v25 = vld [vmem:[#allocation6 + $0x8] sm:$0xff]  ;;  %v97_v26 = vld [vmem:[#allocation6 + $0x10] sm:$0xff]  ;;  %v98_v27 = vld [vmem:[#allocation6 + $0x18] sm:$0xff] }
  0x3e   :  { %v99_v28 = vld [vmem:[#allocation6 + $0x20] sm:$0xff]  ;;  %v100_v29 = vld [vmem:[#allocation6 + $0x28] sm:$0xff]  ;;  %v101_v30 = vld [vmem:[#allocation6 + $0x30] sm:$0xff] }
  0x3f   :  { %1013 = vmatpush3.bf16.msra.mxu0 %v1010_v5  ;;  %v102_v31 = vld [vmem:[#allocation6 + $0x38] sm:$0xff]  ;;  %v103_v32 = vld [vmem:[#allocation6 + $0x40] sm:$0xff]  ;;  %v104_v33 = vld [vmem:[#allocation6 + $0x48] sm:$0xff] }
  0x40   :  { %1015 = vmatprep.subr.bf16.mxu0 %v1014_v8  ;;  %v105_v34 = vld [vmem:[#allocation6 + $0x50] sm:$0xff]  ;;  %v106_v35 = vld [vmem:[#allocation6 + $0x58] sm:$0xff]  ;;  %v107_v36 = vld [vmem:[#allocation6 + $0x60] sm:$0xff] }
  0x41   :  { %v108_v37 = vld [vmem:[#allocation6 + $0x68] sm:$0xff]  ;;  %v109_v38 = vld [vmem:[#allocation6 + $0x70] sm:$0xff]  ;;  %v110_v39 = vld [vmem:[#allocation6 + $0x78] sm:$0xff] }
  0x42   :  { %v111_v40 = vld [vmem:[#allocation6 + $0x80] sm:$0xff]  ;;  %v112_v41 = vld [vmem:[#allocation6 + $0x88] sm:$0xff]  ;;  %v113_v42 = vld [vmem:[#allocation6 + $0x90] sm:$0xff] }
  0x43   :  { %1017 = vmatpush3.bf16.msra.mxu0 %v1014_v8  ;;  %v114_v43 = vld [vmem:[#allocation6 + $0x98] sm:$0xff]  ;;  %v115_v44 = vld [vmem:[#allocation6 + $0xa0] sm:$0xff]  ;;  %v116_v45 = vld [vmem:[#allocation6 + $0xa8] sm:$0xff] }
  0x44   :  { %1019 = vmatprep.subr.bf16.mxu0 %v1018_v12  ;;  %v117_v46 = vld [vmem:[#allocation6 + $0xb0] sm:$0xff]  ;;  %v118_v47 = vld [vmem:[#allocation6 + $0xb8] sm:$0xff]  ;;  %v119_v48 = vld [vmem:[#allocation6 + $0xc0] sm:$0xff] }
  0x45   :  { %v120_v49 = vld [vmem:[#allocation6 + $0xc8] sm:$0xff]  ;;  %v121_v50 = vld [vmem:[#allocation6 + $0xd0] sm:$0xff]  ;;  %v122_v51 = vld [vmem:[#allocation6 + $0xd8] sm:$0xff] }
  0x46   :  { %v123_v52 = vld [vmem:[#allocation6 + $0xe0] sm:$0xff]  ;;  %v124_v53 = vld [vmem:[#allocation6 + $0xe8] sm:$0xff]  ;;  %v125_v54 = vld [vmem:[#allocation6 + $0xf0] sm:$0xff] }
  0x47   :  { %1021 = vmatpush3.bf16.msra.mxu0 %v1018_v12  ;;  %v126_v55 = vld [vmem:[#allocation6 + $0xf8] sm:$0xff]  ;;  %v425_v57 = vld [vmem:[#allocation3 + $0xc8] sm:$0xff] }
  0x48   :  { %1023 = vmatprep.subr.bf16.mxu0 %v1022_v15  ;;  %588 = vmatprep.mubr.f32.mxu1 %v425_v57  ;;  %v401_v58 = vld [vmem:[#allocation3 + $0x8] sm:$0xff] }
  0x49   :  { %v433_v57 = vld [vmem:[#allocation3 + $0x108] sm:$0xff] }
  0x4b   :  { %1025 = vmatpush3.bf16.msra.mxu0 %v1022_v15 }
  0x4c   :  { %1027 = vmatprep.subr.bf16.mxu0 %v1026_v18 }
  0x4f   :  { %1029 = vmatpush3.bf16.msra.mxu0 %v1026_v18 }
  0x50   :  { %1031 = vmatprep.subr.bf16.mxu0 %v1030_v21 }
  0x53   :  { %1033 = vmatpush3.bf16.msra.mxu0 %v1030_v21 }
  0x54   :  { %1035 = vmatprep.subr.bf16.mxu0 %v1034_v24 }
  0x57   :  { %1037 = vmatpush3.bf16.msra.mxu0 %v1034_v24 }
  0x58   :  { %1038 = vmatprep.subr.bf16.mxu0 %v1228_v56 }
  0x5a   :  { %959 = vmatmul.mubr.f32.vlgmr.msra.gmra.mrb[0].mxu0 %v96_v25 }
  0x5b   :  { %961 = vmatprep.mubr.f32.mxu0 %v97_v26 }
  0x5e   :  { %962 = vmatmul.mubr.f32.gmra.mrb[2].mxu0 %v98_v27 }
  0x5f   :  { %964 = vmatprep.mubr.f32.mxu0 %v99_v28 }
  0x62   :  { %965 = vmatmul.mubr.f32.gmra.mrb[4].mxu0 %v100_v29 }
  0x63   :  { %967 = vmatprep.mubr.f32.mxu0 %v101_v30 }
  0x66   :  { %968 = vmatmul.mubr.f32.gmra.mrb[6].mxu0 %v102_v31 }
  0x67   :  { %970 = vmatprep.mubr.f32.mxu0 %v103_v32 }
  0x6a   :  { %971 = vmatmul.mubr.f32.gmra.mrb[8].mxu0 %v104_v33 }
  0x6b   :  { %973 = vmatprep.mubr.f32.mxu0 %v105_v34 }
  0x6e   :  { %974 = vmatmul.mubr.f32.gmra.mrb[10].mxu0 %v106_v35 }
  0x6f   :  { %976 = vmatprep.mubr.f32.mxu0 %v107_v36 }
  0x72   :  { %977 = vmatmul.mubr.f32.gmra.mrb[12].mxu0 %v108_v37 }
  0x73   :  { %979 = vmatprep.mubr.f32.mxu0 %v109_v38 }
  0x76   :  { %980 = vmatmul.mubr.f32.gmra.mrb[14].mxu0 %v110_v39 }
  0x77   :  { %982 = vmatprep.mubr.f32.mxu0 %v111_v40 }
  0x7a   :  { %983 = vmatmul.mubr.f32.gmra.mrb[16].mxu0 %v112_v41 }
  0x7b   :  { %985 = vmatprep.mubr.f32.mxu0 %v113_v42 }
  0x7e   :  { %986 = vmatmul.mubr.f32.gmra.mrb[18].mxu0 %v114_v43  ;;  %v424_v43 = vld [vmem:[#allocation3 + $0xc0] sm:$0xff] }
  0x7f   :  { %988 = vmatprep.mubr.f32.mxu0 %v115_v44  ;;  %v400_v44 = vld [vmem:[#allocation3] sm:$0xff] }
  0x82   :  { %989 = vmatmul.mubr.f32.gmra.mrb[20].mxu0 %v116_v45  ;;  %v427_v45 = vld [vmem:[#allocation3 + $0xd8] sm:$0xff] }
  0x83   :  { %991 = vmatprep.mubr.f32.mxu0 %v117_v46  ;;  %v403_v46 = vld [vmem:[#allocation3 + $0x18] sm:$0xff] }
  0x86   :  { %992 = vmatmul.mubr.f32.gmra.mrb[22].mxu0 %v118_v47  ;;  %v426_v47 = vld [vmem:[#allocation3 + $0xd0] sm:$0xff] }
  0x87   :  { %994 = vmatprep.mubr.f32.mxu0 %v119_v48  ;;  %v402_v48 = vld [vmem:[#allocation3 + $0x10] sm:$0xff] }
  0x8a   :  { %995 = vmatmul.mubr.f32.gmra.mrb[24].mxu0 %v120_v49  ;;  %v429_v49 = vld [vmem:[#allocation3 + $0xe8] sm:$0xff] }
  0x8b   :  { %997 = vmatprep.mubr.f32.mxu0 %v121_v50  ;;  %v405_v50 = vld [vmem:[#allocation3 + $0x28] sm:$0xff] }
  0x8e   :  { %998 = vmatmul.mubr.f32.gmra.mrb[26].mxu0 %v122_v51  ;;  %v428_v51 = vld [vmem:[#allocation3 + $0xe0] sm:$0xff] }
  0x8f   :  { %1000 = vmatprep.mubr.f32.mxu0 %v123_v52  ;;  %v404_v52 = vld [vmem:[#allocation3 + $0x20] sm:$0xff] }
  0x92   :  { %1001 = vmatmul.mubr.f32.gmra.mrb[28].mxu0 %v124_v53  ;;  %v431_v53 = vld [vmem:[#allocation3 + $0xf8] sm:$0xff] }
  0x93   :  { %1003 = vmatprep.mubr.f32.mxu0 %v125_v54  ;;  %v407_v54 = vld [vmem:[#allocation3 + $0x38] sm:$0xff] }
  0x96   :  { %1004 = vmatmul.mubr.f32.gmra.mrb[30].mxu0 %v126_v55  ;;  %v430_v55 = vld [vmem:[#allocation3 + $0xf0] sm:$0xff] }
  0x97   :  { %528 = vmatprep.mubr.f32.mxu0 %v401_v58  ;;  %v409_v58 = vld [vmem:[#allocation3 + $0x48] sm:$0xff] }
 0x12d   :  { %v960_v59 = vpop.f32.mrb[0].mxu0 }
 0x12e   :  { %v209_v60 = vpop.f32.mrb[1].mxu0 }
 0x12f   :  { %v1039_v61 = vpack.c.bf16 %v960_v59, %v209_v60  ;;  %v432_v59 = vld [vmem:[#allocation3 + $0x100] sm:$0xff] }
 0x130   :  { %v408_v60 = vld [vmem:[#allocation3 + $0x40] sm:$0xff] }
 0x131   :  { %v963_v62 = vpop.f32.mrb[2].mxu0  ;;  %1040 = vmatpush1.bf16.msra.mxu0 %v1039_v61  ;;  %1102 = vmatpush1.bf16.msra.mxu1 %v1039_v61  ;;  %v435_v61 = vld [vmem:[#allocation3 + $0x118] sm:$0xff] }
 0x132   :  { %v219_v63 = vpop.f32.mrb[3].mxu0  ;;  %1041 = vmatprep.subr.bf16.mxu0 %v1228_v56  ;;  %1087 = vmatprep.subr.bf16.mxu1 %v1228_v56 }
 0x133   :  { %v1042_v0 = vpack.c.bf16 %v963_v62, %v219_v63  ;;  %v411_v62 = vld [vmem:[#allocation3 + $0x58] sm:$0xff]  ;;  %v434_v63 = vld [vmem:[#allocation3 + $0x110] sm:$0xff] }
 0x135   :  { %v966_v1 = vpop.f32.mrb[4].mxu0  ;;  %1043 = vmatpush1.bf16.msra.mxu0 %v1042_v0  ;;  %1103 = vmatpush1.bf16.msra.mxu1 %v1042_v0  ;;  %v410_v0 = vld [vmem:[#allocation3 + $0x50] sm:$0xff] }
 0x136   :  { %v229_v2 = vpop.f32.mrb[5].mxu0  ;;  %1044 = vmatprep.subr.bf16.mxu0 %v1228_v56  ;;  %1088 = vmatprep.subr.bf16.mxu1 %v1228_v56 }
 0x137   :  { %v1045_v3 = vpack.c.bf16 %v966_v1, %v229_v2  ;;  %v437_v1 = vld [vmem:[#allocation3 + $0x128] sm:$0xff] }
 0x138   :  { %v413_v2 = vld [vmem:[#allocation3 + $0x68] sm:$0xff] }
 0x139   :  { %v969_v4 = vpop.f32.mrb[6].mxu0  ;;  %1046 = vmatpush1.bf16.msra.mxu0 %v1045_v3  ;;  %1104 = vmatpush1.bf16.msra.mxu1 %v1045_v3  ;;  %v436_v3 = vld [vmem:[#allocation3 + $0x120] sm:$0xff] }
 0x13a   :  { %v239_v5 = vpop.f32.mrb[7].mxu0  ;;  %1047 = vmatprep.subr.bf16.mxu0 %v1228_v56  ;;  %1089 = vmatprep.subr.bf16.mxu1 %v1228_v56 }
 0x13b   :  { %v1048_v6 = vpack.c.bf16 %v969_v4, %v239_v5  ;;  %v412_v4 = vld [vmem:[#allocation3 + $0x60] sm:$0xff]  ;;  %v439_v5 = vld [vmem:[#allocation3 + $0x138] sm:$0xff] }
 0x13d   :  { %v972_v7 = vpop.f32.mrb[8].mxu0  ;;  %1049 = vmatpush1.bf16.msra.mxu0 %v1048_v6  ;;  %1105 = vmatpush1.bf16.msra.mxu1 %v1048_v6  ;;  %v415_v6 = vld [vmem:[#allocation3 + $0x78] sm:$0xff] }
 0x13e   :  { %v249_v8 = vpop.f32.mrb[9].mxu0  ;;  %1050 = vmatprep.subr.bf16.mxu0 %v1228_v56  ;;  %1090 = vmatprep.subr.bf16.mxu1 %v1228_v56 }
 0x13f   :  { %v1051_v9 = vpack.c.bf16 %v972_v7, %v249_v8  ;;  %v438_v7 = vld [vmem:[#allocation3 + $0x130] sm:$0xff] }
 0x140   :  { %v414_v8 = vld [vmem:[#allocation3 + $0x70] sm:$0xff] }
 0x141   :  { %v975_v10 = vpop.f32.mrb[10].mxu0  ;;  %1052 = vmatpush1.bf16.msra.mxu0 %v1051_v9  ;;  %1106 = vmatpush1.bf16.msra.mxu1 %v1051_v9  ;;  %v441_v9 = vld [vmem:[#allocation3 + $0x148] sm:$0xff] }
 0x142   :  { %v259_v11 = vpop.f32.mrb[11].mxu0  ;;  %1053 = vmatprep.subr.bf16.mxu0 %v1228_v56  ;;  %1091 = vmatprep.subr.bf16.mxu1 %v1228_v56 }
 0x143   :  { %v1054_v12 = vpack.c.bf16 %v975_v10, %v259_v11  ;;  %v417_v10 = vld [vmem:[#allocation3 + $0x88] sm:$0xff]  ;;  %v440_v11 = vld [vmem:[#allocation3 + $0x140] sm:$0xff] }
 0x145   :  { %v978_v13 = vpop.f32.mrb[12].mxu0  ;;  %1055 = vmatpush1.bf16.msra.mxu0 %v1054_v12  ;;  %1107 = vmatpush1.bf16.msra.mxu1 %v1054_v12  ;;  %v416_v12 = vld [vmem:[#allocation3 + $0x80] sm:$0xff] }
 0x146   :  { %v269_v14 = vpop.f32.mrb[13].mxu0  ;;  %1056 = vmatprep.subr.bf16.mxu0 %v1228_v56  ;;  %1092 = vmatprep.subr.bf16.mxu1 %v1228_v56 }
 0x147   :  { %v1057_v15 = vpack.c.bf16 %v978_v13, %v269_v14  ;;  %v443_v13 = vld [vmem:[#allocation3 + $0x158] sm:$0xff] }
 0x148   :  { %v419_v14 = vld [vmem:[#allocation3 + $0x98] sm:$0xff] }
 0x149   :  { %v981_v16 = vpop.f32.mrb[14].mxu0  ;;  %1058 = vmatpush1.bf16.msra.mxu0 %v1057_v15  ;;  %1108 = vmatpush1.bf16.msra.mxu1 %v1057_v15  ;;  %v442_v15 = vld [vmem:[#allocation3 + $0x150] sm:$0xff] }
 0x14a   :  { %v279_v17 = vpop.f32.mrb[15].mxu0  ;;  %1059 = vmatprep.subr.bf16.mxu0 %v1228_v56  ;;  %1093 = vmatprep.subr.bf16.mxu1 %v1228_v56 }
 0x14b   :  { %v1060_v18 = vpack.c.bf16 %v981_v16, %v279_v17  ;;  %v418_v16 = vld [vmem:[#allocation3 + $0x90] sm:$0xff]  ;;  %v445_v17 = vld [vmem:[#allocation3 + $0x168] sm:$0xff] }
 0x14d   :  { %v984_v19 = vpop.f32.mrb[16].mxu0  ;;  %1061 = vmatpush1.bf16.msra.mxu0 %v1060_v18  ;;  %1109 = vmatpush1.bf16.msra.mxu1 %v1060_v18  ;;  %v421_v18 = vld [vmem:[#allocation3 + $0xa8] sm:$0xff] }
 0x14e   :  { %v289_v20 = vpop.f32.mrb[17].mxu0  ;;  %1062 = vmatprep.subr.bf16.mxu0 %v1228_v56  ;;  %1094 = vmatprep.subr.bf16.mxu1 %v1228_v56 }
 0x14f   :  { %v1063_v21 = vpack.c.bf16 %v984_v19, %v289_v20  ;;  %v444_v19 = vld [vmem:[#allocation3 + $0x160] sm:$0xff] }
 0x150   :  { %v420_v20 = vld [vmem:[#allocation3 + $0xa0] sm:$0xff] }
 0x151   :  { %v987_v22 = vpop.f32.mrb[18].mxu0  ;;  %1064 = vmatpush1.bf16.msra.mxu0 %v1063_v21  ;;  %1110 = vmatpush1.bf16.msra.mxu1 %v1063_v21  ;;  %v447_v21 = vld [vmem:[#allocation3 + $0x178] sm:$0xff] }
 0x152   :  { %v299_v23 = vpop.f32.mrb[19].mxu0  ;;  %1065 = vmatprep.subr.bf16.mxu0 %v1228_v56  ;;  %1095 = vmatprep.subr.bf16.mxu1 %v1228_v56 }
 0x153   :  { %v1066_v24 = vpack.c.bf16 %v987_v22, %v299_v23  ;;  %v423_v22 = vld [vmem:[#allocation3 + $0xb8] sm:$0xff]  ;;  %v446_v23 = vld [vmem:[#allocation3 + $0x170] sm:$0xff] }
 0x155   :  { %v990_v25 = vpop.f32.mrb[20].mxu0  ;;  %1067 = vmatpush1.bf16.msra.mxu0 %v1066_v24  ;;  %1111 = vmatpush1.bf16.msra.mxu1 %v1066_v24  ;;  %v422_v24 = vld [vmem:[#allocation3 + $0xb0] sm:$0xff] }
 0x156   :  { %v309_v26 = vpop.f32.mrb[21].mxu0  ;;  %1068 = vmatprep.subr.bf16.mxu0 %v1228_v56  ;;  %1096 = vmatprep.subr.bf16.mxu1 %v1228_v56 }
 0x157   :  { %v1069_v27 = vpack.c.bf16 %v990_v25, %v309_v26  ;;  %v449_v25 = vld [vmem:[#allocation3 + $0x188] sm:$0xff]  ;;  %v448_v26 = vld [vmem:[#allocation3 + $0x180] sm:$0xff] }
 0x159   :  { %v993_v28 = vpop.f32.mrb[22].mxu0  ;;  %1070 = vmatpush1.bf16.msra.mxu0 %v1069_v27  ;;  %1112 = vmatpush1.bf16.msra.mxu1 %v1069_v27  ;;  %v451_v27 = vld [vmem:[#allocation3 + $0x198] sm:$0xff] }
 0x15a   :  { %v319_v29 = vpop.f32.mrb[23].mxu0  ;;  %1071 = vmatprep.subr.bf16.mxu0 %v1228_v56  ;;  %1097 = vmatprep.subr.bf16.mxu1 %v1228_v56 }
 0x15b   :  { %v1072_v30 = vpack.c.bf16 %v993_v28, %v319_v29  ;;  %v450_v28 = vld [vmem:[#allocation3 + $0x190] sm:$0xff]  ;;  %v453_v29 = vld [vmem:[#allocation3 + $0x1a8] sm:$0xff] }
 0x15d   :  { %v996_v31 = vpop.f32.mrb[24].mxu0  ;;  %1073 = vmatpush1.bf16.msra.mxu0 %v1072_v30  ;;  %1113 = vmatpush1.bf16.msra.mxu1 %v1072_v30  ;;  %v452_v30 = vld [vmem:[#allocation3 + $0x1a0] sm:$0xff] }
 0x15e   :  { %v329_v32 = vpop.f32.mrb[25].mxu0  ;;  %1074 = vmatprep.subr.bf16.mxu0 %v1228_v56  ;;  %1098 = vmatprep.subr.bf16.mxu1 %v1228_v56 }
 0x15f   :  { %v1075_v33 = vpack.c.bf16 %v996_v31, %v329_v32  ;;  %v455_v31 = vld [vmem:[#allocation3 + $0x1b8] sm:$0xff]  ;;  %v454_v32 = vld [vmem:[#allocation3 + $0x1b0] sm:$0xff] }
 0x161   :  { %v999_v34 = vpop.f32.mrb[26].mxu0  ;;  %1076 = vmatpush1.bf16.msra.mxu0 %v1075_v33  ;;  %1114 = vmatpush1.bf16.msra.mxu1 %v1075_v33  ;;  %v457_v33 = vld [vmem:[#allocation3 + $0x1c8] sm:$0xff] }
 0x162   :  { %v339_v35 = vpop.f32.mrb[27].mxu0  ;;  %1077 = vmatprep.subr.bf16.mxu0 %v1228_v56  ;;  %1099 = vmatprep.subr.bf16.mxu1 %v1228_v56 }
 0x163   :  { %v1078_v36 = vpack.c.bf16 %v999_v34, %v339_v35  ;;  %v456_v34 = vld [vmem:[#allocation3 + $0x1c0] sm:$0xff]  ;;  %v459_v35 = vld [vmem:[#allocation3 + $0x1d8] sm:$0xff] }
 0x165   :  { %v1002_v37 = vpop.f32.mrb[28].mxu0  ;;  %1079 = vmatpush1.bf16.msra.mxu0 %v1078_v36  ;;  %1115 = vmatpush1.bf16.msra.mxu1 %v1078_v36  ;;  %v458_v36 = vld [vmem:[#allocation3 + $0x1d0] sm:$0xff] }
 0x166   :  { %v349_v38 = vpop.f32.mrb[29].mxu0  ;;  %1080 = vmatprep.subr.bf16.mxu0 %v1228_v56  ;;  %1100 = vmatprep.subr.bf16.mxu1 %v1228_v56 }
 0x167   :  { %v1081_v39 = vpack.c.bf16 %v1002_v37, %v349_v38  ;;  %v461_v37 = vld [vmem:[#allocation3 + $0x1e8] sm:$0xff]  ;;  %v460_v38 = vld [vmem:[#allocation3 + $0x1e0] sm:$0xff] }
 0x169   :  { %v1005_v40 = vpop.f32.mrb[30].mxu0  ;;  %1082 = vmatpush1.bf16.msra.mxu0 %v1081_v39  ;;  %1116 = vmatpush1.bf16.msra.mxu1 %v1081_v39  ;;  %v463_v39 = vld [vmem:[#allocation3 + $0x1f8] sm:$0xff] }
 0x16a   :  { %v359_v41 = vpop.f32.mrb[31].mxu0  ;;  %1083 = vmatprep.subr.bf16.mxu0 %v1228_v56  ;;  %1101 = vmatprep.subr.bf16.mxu1 %v1228_v56  ;;  %v406_v56 = vld [vmem:[#allocation3 + $0x30] sm:$0xff] }
 0x16b   :  { %v1084_v42 = vpack.c.bf16 %v1005_v40, %v359_v41  ;;  %v462_v40 = vld [vmem:[#allocation3 + $0x1f0] sm:$0xff]  ;;  %v1332_v41 = vld [vmem:[%s1384_s3] ss:$0 sm:$0xff]  ;;  %s1229_s3 = smov [#allocation9]  }
 0x16c   :  { %s864_s30 = sshll.u32 %s1229_s3, 4  ;;  %s865_s30 = int_to_ptr.vmem [resolvable:$true] %s864_s30 }
 0x16d   :  { %1085 = vmatpush1.bf16.msra.mxu0 %v1084_v42  ;;  %1117 = vmatpush1.bf16.msra.mxu1 %v1084_v42  ;;  %s1193_s5 = scalar_lea.vmem %s865_s30, 4096  ;;  %p1198_p11 = scmp.lt.s32.totalorder %s865_s30, %s865_s30 }
 0x16e   :  { %p1194_p10 = scmp.ne.s32.totalorder %s865_s30, %s1193_s5  ;;  %p1199_p12 = scmp.lt.s32.totalorder %s1193_s5, %s1193_s5 }
 0x170   :  { %589 = vmatmul.mubr.f32.vlgmr.msra.gmra.mrb[0].mxu1 %v424_v43  ;;  %529 = vmatmul.mubr.f32.vlgmr.msra.gmra.mrb[32].mxu0 %v400_v44  ;;  %p1200_p13 = por %p1199_p12, %p1198_p11 }
 0x171   :  { %593 = vmatprep.mubr.f32.mxu1 %v427_v45  ;;  %533 = vmatprep.mubr.f32.mxu0 %v403_v46 }
 0x172   :  { %p1201_p0 = pnand %p1200_p13, %p1194_p10 }
 0x174   :  { %594 = vmatmul.mubr.f32.gmra.mrb[2].mxu1 %v426_v47  ;;  %534 = vmatmul.mubr.f32.gmra.mrb[34].mxu0 %v402_v48 }
 0x175   :  { %598 = vmatprep.mubr.f32.mxu1 %v429_v49  ;;  %538 = vmatprep.mubr.f32.mxu0 %v405_v50 }
 0x178   :  { %599 = vmatmul.mubr.f32.gmra.mrb[4].mxu1 %v428_v51  ;;  %539 = vmatmul.mubr.f32.gmra.mrb[36].mxu0 %v404_v52 }
 0x179   :  { %603 = vmatprep.mubr.f32.mxu1 %v431_v53  ;;  %543 = vmatprep.mubr.f32.mxu0 %v407_v54 }
 0x17c   :  { %604 = vmatmul.mubr.f32.gmra.mrb[6].mxu1 %v430_v55  ;;  %544 = vmatmul.mubr.f32.gmra.mrb[38].mxu0 %v406_v56 }
 0x17d   :  { %608 = vmatprep.mubr.f32.mxu1 %v433_v57  ;;  %548 = vmatprep.mubr.f32.mxu0 %v409_v58 }
 0x180   :  { %609 = vmatmul.mubr.f32.gmra.mrb[8].mxu1 %v432_v59  ;;  %549 = vmatmul.mubr.f32.gmra.mrb[40].mxu0 %v408_v60 }
 0x181   :  { %613 = vmatprep.mubr.f32.mxu1 %v435_v61  ;;  %553 = vmatprep.mubr.f32.mxu0 %v411_v62 }
 0x184   :  { %614 = vmatmul.mubr.f32.gmra.mrb[10].mxu1 %v434_v63  ;;  %554 = vmatmul.mubr.f32.gmra.mrb[42].mxu0 %v410_v0 }
 0x185   :  { %618 = vmatprep.mubr.f32.mxu1 %v437_v1  ;;  %558 = vmatprep.mubr.f32.mxu0 %v413_v2 }
 0x188   :  { %619 = vmatmul.mubr.f32.gmra.mrb[12].mxu1 %v436_v3  ;;  %559 = vmatmul.mubr.f32.gmra.mrb[44].mxu0 %v412_v4 }
 0x189   :  { %623 = vmatprep.mubr.f32.mxu1 %v439_v5  ;;  %563 = vmatprep.mubr.f32.mxu0 %v415_v6 }
 0x18c   :  { %624 = vmatmul.mubr.f32.gmra.mrb[14].mxu1 %v438_v7  ;;  %564 = vmatmul.mubr.f32.gmra.mrb[46].mxu0 %v414_v8 }
 0x18d   :  { %628 = vmatprep.mubr.f32.mxu1 %v441_v9  ;;  %568 = vmatprep.mubr.f32.mxu0 %v417_v10 }
 0x190   :  { %629 = vmatmul.mubr.f32.gmra.mrb[16].mxu1 %v440_v11  ;;  %569 = vmatmul.mubr.f32.gmra.mrb[48].mxu0 %v416_v12 }
 0x191   :  { %633 = vmatprep.mubr.f32.mxu1 %v443_v13  ;;  %573 = vmatprep.mubr.f32.mxu0 %v419_v14 }
 0x194   :  { %634 = vmatmul.mubr.f32.gmra.mrb[18].mxu1 %v442_v15  ;;  %574 = vmatmul.mubr.f32.gmra.mrb[50].mxu0 %v418_v16 }
 0x195   :  { %638 = vmatprep.mubr.f32.mxu1 %v445_v17  ;;  %578 = vmatprep.mubr.f32.mxu0 %v421_v18 }
 0x198   :  { %639 = vmatmul.mubr.f32.gmra.mrb[20].mxu1 %v444_v19  ;;  %579 = vmatmul.mubr.f32.gmra.mrb[52].mxu0 %v420_v20 }
 0x199   :  { %643 = vmatprep.mubr.f32.mxu1 %v447_v21  ;;  %583 = vmatprep.mubr.f32.mxu0 %v423_v22 }
 0x19c   :  { %644 = vmatmul.mubr.f32.gmra.mrb[22].mxu1 %v446_v23  ;;  %584 = vmatmul.mubr.f32.gmra.mrb[54].mxu0 %v422_v24 }
 0x19d   :  { %648 = vmatprep.mubr.f32.mxu1 %v449_v25 }
 0x1a0   :  { %649 = vmatmul.mubr.f32.gmra.mrb[24].mxu1 %v448_v26 }
 0x1a1   :  { %653 = vmatprep.mubr.f32.mxu1 %v451_v27 }
 0x1a4   :  { %654 = vmatmul.mubr.f32.gmra.mrb[26].mxu1 %v450_v28 }
 0x1a5   :  { %658 = vmatprep.mubr.f32.mxu1 %v453_v29 }
 0x1a8   :  { %659 = vmatmul.mubr.f32.gmra.mrb[28].mxu1 %v452_v30 }
 0x1a9   :  { %663 = vmatprep.mubr.f32.mxu1 %v455_v31 }
 0x1ac   :  { %664 = vmatmul.mubr.f32.gmra.mrb[30].mxu1 %v454_v32 }
 0x1ad   :  { %668 = vmatprep.mubr.f32.mxu1 %v457_v33 }
 0x1b0   :  { %669 = vmatmul.mubr.f32.gmra.mrb[32].mxu1 %v456_v34 }
 0x1b1   :  { %673 = vmatprep.mubr.f32.mxu1 %v459_v35 }
 0x1b4   :  { %674 = vmatmul.mubr.f32.gmra.mrb[34].mxu1 %v458_v36 }
 0x1b5   :  { %678 = vmatprep.mubr.f32.mxu1 %v461_v37 }
 0x1b8   :  { %679 = vmatmul.mubr.f32.gmra.mrb[36].mxu1 %v460_v38 }
 0x1b9   :  { %683 = vmatprep.mubr.f32.mxu1 %v463_v39 }
 0x1bc   :  { %684 = vmatmul.mubr.f32.gmra.mrb[38].mxu1 %v462_v40 }
 0x243   :  { %v590_v42 = vpop.f32.mrb[0].mxu1  ;;  %v530_v43 = vpop.f32.mrb[32].mxu0 }
 0x244   :  { %v807_v44 = vadd.f32 %v1332_v41, %v590_v42  ;;  %v592_v45 = vpop.f32.mrb[1].mxu1  ;;  %v795_v46 = vadd.f32 %v1332_v41, %v530_v43  ;;  %v532_v47 = vpop.f32.mrb[33].mxu0 }
 0x246   :  { %839 = vst [vmem:[#allocation9 + $0x60] sm:$0xff] %v807_v44  ;;  %827 = vst [vmem:[#allocation9] sm:$0xff] %v795_v46 }
 0x247   :  { %v595_v48 = vpop.f32.mrb[2].mxu1  ;;  %v535_v49 = vpop.f32.mrb[34].mxu0 }
 0x248   :  { %v808_v50 = vadd.f32 %v1332_v41, %v595_v48  ;;  %v597_v51 = vpop.f32.mrb[3].mxu1  ;;  %v796_v52 = vadd.f32 %v1332_v41, %v535_v49  ;;  %v537_v53 = vpop.f32.mrb[35].mxu0 }
 0x24a   :  { %840 = vst [vmem:[#allocation9 + $0x68] sm:$0xff] %v808_v50  ;;  %828 = vst [vmem:[#allocation9 + $0x8] sm:$0xff] %v796_v52 }
 0x24b   :  { %v600_v54 = vpop.f32.mrb[4].mxu1  ;;  %v540_v55 = vpop.f32.mrb[36].mxu0 }
 0x24c   :  { %v809_v56 = vadd.f32 %v1332_v41, %v600_v54  ;;  %v602_v57 = vpop.f32.mrb[5].mxu1  ;;  %v797_v58 = vadd.f32 %v1332_v41, %v540_v55  ;;  %v542_v59 = vpop.f32.mrb[37].mxu0 }
 0x24e   :  { %841 = vst [vmem:[#allocation9 + $0x70] sm:$0xff] %v809_v56  ;;  %829 = vst [vmem:[#allocation9 + $0x10] sm:$0xff] %v797_v58 }
 0x24f   :  { %v605_v60 = vpop.f32.mrb[6].mxu1  ;;  %v545_v61 = vpop.f32.mrb[38].mxu0 }
 0x250   :  { %v810_v62 = vadd.f32 %v1332_v41, %v605_v60  ;;  %v607_v63 = vpop.f32.mrb[7].mxu1  ;;  %v798_v0 = vadd.f32 %v1332_v41, %v545_v61  ;;  %v547_v1 = vpop.f32.mrb[39].mxu0 }
 0x252   :  { %842 = vst [vmem:[#allocation9 + $0x78] sm:$0xff] %v810_v62  ;;  %830 = vst [vmem:[#allocation9 + $0x18] sm:$0xff] %v798_v0 }
 0x253   :  { %v610_v2 = vpop.f32.mrb[8].mxu1  ;;  %v550_v3 = vpop.f32.mrb[40].mxu0 }
 0x254   :  { %v811_v4 = vadd.f32 %v1332_v41, %v610_v2  ;;  %v612_v5 = vpop.f32.mrb[9].mxu1  ;;  %v799_v6 = vadd.f32 %v1332_v41, %v550_v3  ;;  %v552_v7 = vpop.f32.mrb[41].mxu0 }
 0x256   :  { %843 = vst [vmem:[#allocation9 + $0x80] sm:$0xff] %v811_v4  ;;  %831 = vst [vmem:[#allocation9 + $0x20] sm:$0xff] %v799_v6 }
 0x257   :  { %v615_v8 = vpop.f32.mrb[10].mxu1  ;;  %v555_v9 = vpop.f32.mrb[42].mxu0 }
 0x258   :  { %v812_v10 = vadd.f32 %v1332_v41, %v615_v8  ;;  %v617_v11 = vpop.f32.mrb[11].mxu1  ;;  %v800_v12 = vadd.f32 %v1332_v41, %v555_v9  ;;  %v557_v13 = vpop.f32.mrb[43].mxu0 }
 0x25a   :  { %844 = vst [vmem:[#allocation9 + $0x88] sm:$0xff] %v812_v10  ;;  %832 = vst [vmem:[#allocation9 + $0x28] sm:$0xff] %v800_v12 }
 0x25b   :  { %v620_v14 = vpop.f32.mrb[12].mxu1  ;;  %v560_v15 = vpop.f32.mrb[44].mxu0 }
 0x25c   :  { %v813_v16 = vadd.f32 %v1332_v41, %v620_v14  ;;  %v622_v17 = vpop.f32.mrb[13].mxu1  ;;  %v801_v18 = vadd.f32 %v1332_v41, %v560_v15  ;;  %v562_v19 = vpop.f32.mrb[45].mxu0 }
 0x25e   :  { %845 = vst [vmem:[#allocation9 + $0x90] sm:$0xff] %v813_v16  ;;  %833 = vst [vmem:[#allocation9 + $0x30] sm:$0xff] %v801_v18 }
 0x25f   :  { %v625_v20 = vpop.f32.mrb[14].mxu1  ;;  %v565_v21 = vpop.f32.mrb[46].mxu0 }
 0x260   :  { %v814_v22 = vadd.f32 %v1332_v41, %v625_v20  ;;  %v627_v23 = vpop.f32.mrb[15].mxu1  ;;  %v802_v24 = vadd.f32 %v1332_v41, %v565_v21  ;;  %v567_v25 = vpop.f32.mrb[47].mxu0 }
 0x262   :  { %846 = vst [vmem:[#allocation9 + $0x98] sm:$0xff] %v814_v22  ;;  %834 = vst [vmem:[#allocation9 + $0x38] sm:$0xff] %v802_v24 }
 0x263   :  { %v630_v26 = vpop.f32.mrb[16].mxu1  ;;  %v570_v27 = vpop.f32.mrb[48].mxu0 }
 0x264   :  { %v815_v28 = vadd.f32 %v1332_v41, %v630_v26  ;;  %v632_v29 = vpop.f32.mrb[17].mxu1  ;;  %v803_v30 = vadd.f32 %v1332_v41, %v570_v27  ;;  %v572_v31 = vpop.f32.mrb[49].mxu0 }
 0x266   :  { %847 = vst [vmem:[#allocation9 + $0xa0] sm:$0xff] %v815_v28  ;;  %835 = vst [vmem:[#allocation9 + $0x40] sm:$0xff] %v803_v30 }
 0x267   :  { %v635_v32 = vpop.f32.mrb[18].mxu1  ;;  %v575_v33 = vpop.f32.mrb[50].mxu0 }
 0x268   :  { %v816_v34 = vadd.f32 %v1332_v41, %v635_v32  ;;  %v637_v35 = vpop.f32.mrb[19].mxu1  ;;  %v804_v36 = vadd.f32 %v1332_v41, %v575_v33  ;;  %v577_v37 = vpop.f32.mrb[51].mxu0 }
 0x26a   :  { %848 = vst [vmem:[#allocation9 + $0xa8] sm:$0xff] %v816_v34  ;;  %836 = vst [vmem:[#allocation9 + $0x48] sm:$0xff] %v804_v36 }
 0x26b   :  { %v640_v38 = vpop.f32.mrb[20].mxu1  ;;  %v580_v39 = vpop.f32.mrb[52].mxu0 }
 0x26c   :  { %v817_v40 = vadd.f32 %v1332_v41, %v640_v38  ;;  %v642_v42 = vpop.f32.mrb[21].mxu1  ;;  %v805_v43 = vadd.f32 %v1332_v41, %v580_v39  ;;  %v582_v44 = vpop.f32.mrb[53].mxu0 }
 0x26e   :  { %849 = vst [vmem:[#allocation9 + $0xb0] sm:$0xff] %v817_v40  ;;  %837 = vst [vmem:[#allocation9 + $0x50] sm:$0xff] %v805_v43 }
 0x26f   :  { %v645_v45 = vpop.f32.mrb[22].mxu1  ;;  %v585_v46 = vpop.f32.mrb[54].mxu0 }
 0x270   :  { %v818_v47 = vadd.f32 %v1332_v41, %v645_v45  ;;  %v647_v48 = vpop.f32.mrb[23].mxu1  ;;  %v806_v49 = vadd.f32 %v1332_v41, %v585_v46  ;;  %v587_v50 = vpop.f32.mrb[55].mxu0 }
 0x272   :  { %850 = vst [vmem:[#allocation9 + $0xb8] sm:$0xff] %v818_v47  ;;  %838 = vst [vmem:[#allocation9 + $0x58] sm:$0xff] %v806_v49 }
 0x273   :  { %v650_v51 = vpop.f32.mrb[24].mxu1 }
 0x274   :  { %v819_v52 = vadd.f32 %v1332_v41, %v650_v51  ;;  %v652_v53 = vpop.f32.mrb[25].mxu1 }
 0x276   :  { %851 = vst [vmem:[#allocation9 + $0xc0] sm:$0xff] %v819_v52 }
 0x277   :  { %v655_v54 = vpop.f32.mrb[26].mxu1 }
 0x278   :  { %v820_v55 = vadd.f32 %v1332_v41, %v655_v54  ;;  %v657_v56 = vpop.f32.mrb[27].mxu1 }
 0x27a   :  { %852 = vst [vmem:[#allocation9 + $0xc8] sm:$0xff] %v820_v55 }
 0x27b   :  { %v660_v57 = vpop.f32.mrb[28].mxu1 }
 0x27c   :  { %v821_v58 = vadd.f32 %v1332_v41, %v660_v57  ;;  %v662_v59 = vpop.f32.mrb[29].mxu1 }
 0x27e   :  { %853 = vst [vmem:[#allocation9 + $0xd0] sm:$0xff] %v821_v58 }
 0x27f   :  { %v665_v60 = vpop.f32.mrb[30].mxu1 }
 0x280   :  { %v822_v61 = vadd.f32 %v1332_v41, %v665_v60  ;;  %v667_v62 = vpop.f32.mrb[31].mxu1 }
 0x282   :  { %854 = vst [vmem:[#allocation9 + $0xd8] sm:$0xff] %v822_v61 }
 0x283   :  { %v670_v63 = vpop.f32.mrb[32].mxu1 }
 0x284   :  { %v823_v0 = vadd.f32 %v1332_v41, %v670_v63  ;;  %v672_v1 = vpop.f32.mrb[33].mxu1 }
 0x286   :  { %855 = vst [vmem:[#allocation9 + $0xe0] sm:$0xff] %v823_v0 }
 0x287   :  { %v675_v2 = vpop.f32.mrb[34].mxu1 }
 0x288   :  { %v824_v3 = vadd.f32 %v1332_v41, %v675_v2  ;;  %v677_v4 = vpop.f32.mrb[35].mxu1 }
 0x28a   :  { %856 = vst [vmem:[#allocation9 + $0xe8] sm:$0xff] %v824_v3 }
 0x28b   :  { %v680_v5 = vpop.f32.mrb[36].mxu1 }
 0x28c   :  { %v825_v6 = vadd.f32 %v1332_v41, %v680_v5  ;;  %v682_v7 = vpop.f32.mrb[37].mxu1 }
 0x28e   :  { %857 = vst [vmem:[#allocation9 + $0xf0] sm:$0xff] %v825_v6 }
 0x28f   :  { %v685_v8 = vpop.f32.mrb[38].mxu1 }
 0x290   :  { %v826_v9 = vadd.f32 %v1332_v41, %v685_v8  ;;  %v687_v10 = vpop.f32.mrb[39].mxu1 }
 0x292   :  { %858 = vst [vmem:[#allocation9 + $0xf8] sm:$0xff] %v826_v9 }
 0x293   :  { %1204 = shalt.err (!%p1201_p0)
}
 0x294   :  { %s1205_s8 = scalar_lea.hbm %s1385_s4, 4096 }
 0x295   :  { %p1206_p1 = scmp.ne.s32.totalorder %s1385_s4, %s1205_s8  ;;  %p1209_p2 = scmp.lt.u32.totalorder %s1205_s8, %s1385_s4 }
 0x297   :  { %p1211_p3 = pnand %p1209_p2, %p1206_p1 }
 0x299   :  { %1214 = shalt.err (!%p1211_p3)
}
 0x29a   :  { %870 = dma.vmem_to_hbm [thread:$0]  %s865_s30, 4096, %s1385_s4, [#allocation5], %s1222_s25, %s1222_s25, %s1223_s26  }
 0x29b   :  { %1219 = dma.done.wait [#allocation5], 4096  }
 0x29c   :  { %1220 = vsyncadd [#allocation5], 4294963200 }
 0x29d   :  { %874 = vsyncpa [#allocation4], 1 }
 0x29e   :  { %875 = vsyncpa [#allocation7], 1 }
 0x29f   :  { %876 = vsyncpa [#allocation5], 1 }

</bundles_post_ra>
